<compile_context>
chip_gen: v5e
topology: v5e:2x2
jax: 0.10.0
libtpu: 0.0.40
codegen_flags: <defaults>
</compile_context>

<pallas_src>
import jax
import jax.numpy as jnp
from jax.experimental import pallas as pl
from jax.experimental.pallas import tpu as pltpu


def sepconv_kernel(scale_ref, bias_ref, x_ref, w1_ref, dw_ref, w2_ref, o_ref,
                   h_ref):
    # x_ref : (D, H, W, C)        full spatial volume of one batch element (bf16)
    # w1_ref: (C, M) bf16   dw_ref: (3, 3, 3, M) f32   w2_ref: (M, C) bf16
    # o_ref : (TD, H, W, C)       current D-tile of the output (f32)
    # h_ref : (TD+2, H+2, W+2, M) f32 scratch: zero-padded window of the
    #         expanded activation (implements Conv3d padding=1).
    TD, H, W, C = o_ref.shape
    M = w1_ref.shape[1]
    dt = pl.program_id(1)
    d0 = pl.multiple_of(dt * TD, TD)

    scale = scale_ref[0]
    bias = bias_ref[0]
    w1 = w1_ref[...]                                   # (C, M) bf16, kept resident

    def expand(x_rows):
        """pwconv1 + StarReLU for a (n, H, W, C) bf16 slab -> (n, H, W, M) f32."""
        n = x_rows.shape[0]
        hv = jnp.dot(x_rows.reshape(n * H * W, C), w1,
                     preferred_element_type=jnp.float32)   # bf16 x bf16 on the MXU
        r = jnp.maximum(hv, 0.0)
        return (scale * (r * r) + bias).reshape(n, H, W, M)

    # ---- zero-padded expanded-activation window for this D tile ----
    h_ref[...] = jnp.zeros_like(h_ref)                 # borders = conv zero padding
    h_ref[1:TD + 1, 1:H + 1, 1:W + 1, :] = expand(x_ref[pl.ds(d0, TD), :, :, :])

    @pl.when(dt > 0)                                   # top D halo (recompute margin)
    def _():
        h_ref[0:1, 1:H + 1, 1:W + 1, :] = expand(
            x_ref[pl.ds(d0 - 1, 1), :, :, :])

    @pl.when(dt + 1 < pl.num_programs(1))              # bottom D halo
    def _():
        h_ref[TD + 1:TD + 2, 1:H + 1, 1:W + 1, :] = expand(
            x_ref[pl.ds(d0 + TD, 1), :, :, :])

    # ---- depthwise 3x3x3 conv (cross-correlation, per-channel weights) ----
    def kd_body(kd, acc):
        dwk = dw_ref[kd]                               # (3, 3, M): one load per kd
        for kh in range(3):                            # 9 taps unrolled with static
            for kw in range(3):                        # sublane/lane offsets
                win = h_ref[pl.ds(kd, TD), kh:kh + H, kw:kw + W, :]
                acc = acc + win * dwk[kh, kw]
        return acc

    acc = jax.lax.fori_loop(0, 3, kd_body,
                            jnp.zeros((TD, H, W, M), jnp.float32))

    # ---- act2 = Identity; pwconv2 (bf16 operands on the MXU, f32 accum) ----
    y = jnp.dot(acc.reshape(TD * H * W, M).astype(jnp.bfloat16), w2_ref[...],
                preferred_element_type=jnp.float32)    # (TD*H*W, C)
    o_ref[...] = y.reshape(TD, H, W, C).astype(o_ref.dtype)


def sepconv(x, w1, dw, w2, scale, bias, *, d_tile=None):
    """x: (B, D, H, W, C) f32; w1: (C, M); dw: (3, 3, 3, M); w2: (M, C)."""
    B, D, H, W, C = x.shape
    M = w1.shape[1]
    if d_tile is None:
        d_tile = next(t for t in (8, 4, 2, 1) if D % t == 0)
    assert D % d_tile == 0, "d_tile must divide D"
    n_dt = D // d_tile

    # bf16 operands for the MXU matmuls; f32 accumulation happens in-kernel.
    xb = x.astype(jnp.bfloat16)
    w1b = w1.astype(jnp.bfloat16)
    w2b = w2.astype(jnp.bfloat16)
    dwf = dw.astype(jnp.float32)        # depthwise taps stay f32 (VPU math)
    scale = scale.astype(jnp.float32)
    bias = bias.astype(jnp.float32)

    return pl.pallas_call(
        sepconv_kernel,
        out_shape=jax.ShapeDtypeStruct((B, D, H, W, C), x.dtype),
        grid_spec=pltpu.PrefetchScalarGridSpec(
            num_scalar_prefetch=0,
            grid=(B, n_dt),
            in_specs=[
                pl.BlockSpec(memory_space=pltpu.MemorySpace.SMEM),     # scale (1,)
                pl.BlockSpec(memory_space=pltpu.MemorySpace.SMEM),     # bias  (1,)
                # The cheap C-channel input volume stays VMEM-resident across
                # the D tiles of a batch element (index map ignores the tile
                # axis), so halo rows are read without re-DMA.
                pl.BlockSpec((pl.Squeezed(), D, H, W, C),
                             lambda b, t: (b, 0, 0, 0, 0)),            # x  (bf16)
                pl.BlockSpec((C, M), lambda b, t: (0, 0)),             # w1 (bf16)
                pl.BlockSpec((3, 3, 3, M), lambda b, t: (0, 0, 0, 0)), # dw (f32)
                pl.BlockSpec((M, C), lambda b, t: (0, 0)),             # w2 (bf16)
            ],
            out_specs=pl.BlockSpec((pl.Squeezed(), d_tile, H, W, C),
                                   lambda b, t: (b, t, 0, 0, 0)),
            scratch_shapes=[
                # zero-padded expanded-activation window for one D tile
                pltpu.VMEM((d_tile + 2, H + 2, W + 2, M), jnp.float32),
            ],
        ),
        compiler_params=pltpu.CompilerParams(
            dimension_semantics=("parallel", "parallel"),
            vmem_limit_bytes=48 * 1024 * 1024,
        ),
    )(scale, bias, xb, w1b, dwf, w2b)


def sepconv_ref(x, w1, dw, w2, scale, bias):
    """Pure-JAX f32 reference matching the PyTorch SepConv-style forward."""
    h = jnp.einsum("bdhwc,cm->bdhwm", x, w1)
    r = jnp.maximum(h, 0.0)
    h = scale[0] * r * r + bias[0]
    hp = jnp.pad(h, ((0, 0), (1, 1), (1, 1), (1, 1), (0, 0)))
    B, D_, H_, W_, M = h.shape
    acc = jnp.zeros_like(h)
    for kd in range(3):
        for kh in range(3):
            for kw in range(3):
                acc = acc + hp[:, kd:kd + D_, kh:kh + H_, kw:kw + W_, :] * dw[kd, kh, kw, :]
    return jnp.einsum("bdhwm,mc->bdhwc", acc, w2)


if __name__ == "__main__":
    # Small shapes consistent with the module: x is (B, D, H, W, dim).
    B, D_, H_, W_, dim = 2, 4, 4, 4, 8
    expansion_ratio = 2
    med = expansion_ratio * dim

    key = jax.random.PRNGKey(0)
    k_x, k_w1, k_dw, k_w2 = jax.random.split(key, 4)

    x = jax.random.normal(k_x, (B, D_, H_, W_, dim), jnp.float32)
    # nn.Linear(dim, med).weight is (med, dim); stored transposed (dim, med).
    w1 = jax.random.normal(k_w1, (dim, med), jnp.float32) * 0.1
    # nn.Conv3d(med, med, 3, groups=med).weight is (med, 1, 3, 3, 3);
    # stored channels-last as (3, 3, 3, med).
    dw = jax.random.normal(k_dw, (3, 3, 3, med), jnp.float32) * 0.1
    # nn.Linear(med, dim).weight is (dim, med); transposed -> (med, dim).
    w2 = jax.random.normal(k_w2, (med, dim), jnp.float32) * 0.1
    # StarReLU parameters (scale_value=1.0, bias_value=0.0).
    scale = jnp.ones((1,), jnp.float32)
    bias = jnp.zeros((1,), jnp.float32)

    # d_tile=2 -> two D tiles per batch element, exercising both halo paths.
    out = sepconv(x, w1, dw, w2, scale, bias, d_tile=2)
    out = jax.block_until_ready(out)

    ref = sepconv_ref(x, w1, dw, w2, scale, bias)
    assert out.shape == (B, D_, H_, W_, dim)
    # bf16 matmul operands -> compare against the f32 reference with a
    # bf16-appropriate tolerance.
    assert bool(jnp.allclose(out, ref, atol=5e-3, rtol=5e-2)), \
        float(jnp.max(jnp.abs(out - ref)))

    print("KERNEL_OK")
</pallas_src>

<mosaic_0001>
module attributes {stable_mosaic.version = 11 : i64} {
  func.func @sepconv_kernel(%arg0: i32, %arg1: i32, %arg2: memref<1xf32, #tpu.memory_space<smem>>, %arg3: memref<1xf32, #tpu.memory_space<smem>>, %arg4: memref<1x4x4x4x8xbf16, #tpu.memory_space<vmem>>, %arg5: memref<8x16xbf16, #tpu.memory_space<vmem>>, %arg6: memref<3x3x3x16xf32, #tpu.memory_space<vmem>>, %arg7: memref<16x8xbf16, #tpu.memory_space<vmem>>, %arg8: memref<1x2x4x4x8xf32, #tpu.memory_space<vmem>>, %arg9: memref<4x6x6x16xf32, #tpu.memory_space<vmem>>) attributes {dimension_semantics = [#tpu.dimension_semantics<parallel>, #tpu.dimension_semantics<parallel>], iteration_bounds = array<i64: 2, 2>, scalar_prefetch = 0 : i64, scratch_operands = 1 : i64, tpu.core_type = #tpu.core_type<tc>, window_params = [{transform_indices = @transform_0, window_bounds = array<i64: 1>}, {transform_indices = @transform_1, window_bounds = array<i64: 1>}, {transform_indices = @transform_2, window_bounds = array<i64: 1, 4, 4, 4, 8>}, {pipeline_mode = #tpu.pipeline_mode<synchronous>, transform_indices = @transform_3, window_bounds = array<i64: 8, 16>}, {pipeline_mode = #tpu.pipeline_mode<synchronous>, transform_indices = @transform_4, window_bounds = array<i64: 3, 3, 3, 16>}, {pipeline_mode = #tpu.pipeline_mode<synchronous>, transform_indices = @transform_5, window_bounds = array<i64: 16, 8>}, {transform_indices = @transform_6, window_bounds = array<i64: 1, 2, 4, 4, 8>}]} {
    %c2_i32 = arith.constant 2 : i32
    %0 = arith.muli %arg1, %c2_i32 : i32
    %1 = tpu.assume_multiple %0, 2 : i32
    %c0 = arith.constant 0 : index
    %2 = memref.load %arg2[%c0] : memref<1xf32, #tpu.memory_space<smem>>
    %c0_0 = arith.constant 0 : index
    %3 = memref.load %arg3[%c0_0] : memref<1xf32, #tpu.memory_space<smem>>
    %c0_1 = arith.constant 0 : index
    %c0_2 = arith.constant 0 : index
    %4 = vector.load %arg5[%c0_1, %c0_2] : memref<8x16xbf16, #tpu.memory_space<vmem>>, vector<8x16xbf16>
    %cst = arith.constant 0.000000e+00 : f32
    %5 = vector.broadcast %cst : f32 to vector<4x6x6x16xf32>
    %c0_3 = arith.constant 0 : index
    %c0_4 = arith.constant 0 : index
    %c0_5 = arith.constant 0 : index
    %c0_6 = arith.constant 0 : index
    %6 = vector.load %arg9[%c0_3, %c0_4, %c0_5, %c0_6] : memref<4x6x6x16xf32, #tpu.memory_space<vmem>>, vector<4x6x6x16xf32>
    tpu.vector_store %arg9[%c0_3, %c0_4, %c0_5, %c0_6], %5 {strides = array<i32>} : memref<4x6x6x16xf32, #tpu.memory_space<vmem>>, vector<4x6x6x16xf32>,
    %c0_7 = arith.constant 0 : index
    %7 = arith.index_cast %1 : i32 to index
    %c0_8 = arith.constant 0 : index
    %c0_9 = arith.constant 0 : index
    %c0_10 = arith.constant 0 : index
    %8 = vector.load %arg4[%c0_7, %7, %c0_8, %c0_9, %c0_10] : memref<1x4x4x4x8xbf16, #tpu.memory_space<vmem>>, vector<1x2x4x4x8xbf16>
    %9 = vector.shape_cast %8 : vector<1x2x4x4x8xbf16> to vector<2x4x4x8xbf16>
    %10 = vector.shape_cast %9 : vector<2x4x4x8xbf16> to vector<32x8xbf16>
    %cst_11 = arith.constant dense<0.000000e+00> : vector<32x16xf32>
    %11 = tpu.matmul %10, %4, %cst_11 {dimension_numbers = #tpu.dot_dimension_numbers<[1], [0], [0], [1], [0, 0, 1, 1], [], []>} : vector<32x8xbf16>, vector<8x16xbf16>, vector<32x16xf32> -> vector<32x16xf32>
    %cst_12 = arith.constant 0.000000e+00 : f32
    %12 = vector.broadcast %cst_12 : f32 to vector<32x16xf32>
    %13 = arith.maximumf %11, %12 : vector<32x16xf32>
    %14 = arith.mulf %13, %13 : vector<32x16xf32>
    %15 = vector.broadcast %2 : f32 to vector<32x16xf32>
    %16 = arith.mulf %15, %14 : vector<32x16xf32>
    %17 = vector.broadcast %3 : f32 to vector<32x16xf32>
    %18 = arith.addf %16, %17 : vector<32x16xf32>
    %19 = vector.shape_cast %18 : vector<32x16xf32> to vector<2x4x4x16xf32>
    %c1 = arith.constant 1 : index
    %c1_13 = arith.constant 1 : index
    %c1_14 = arith.constant 1 : index
    %c0_15 = arith.constant 0 : index
    %20 = vector.load %arg9[%c1, %c1_13, %c1_14, %c0_15] : memref<4x6x6x16xf32, #tpu.memory_space<vmem>>, vector<2x4x4x16xf32>
    tpu.vector_store %arg9[%c1, %c1_13, %c1_14, %c0_15], %19 {strides = array<i32>} : memref<4x6x6x16xf32, #tpu.memory_space<vmem>>, vector<2x4x4x16xf32>,
    %c0_i32 = arith.constant 0 : i32
    %21 = arith.cmpi sgt, %arg1, %c0_i32 : i32
    %22 = arith.extui %21 : i1 to i32
    %c0_i32_16 = arith.constant 0 : i32
    %23 = arith.cmpi ne, %22, %c0_i32_16 : i32
    scf.if %23 {
      %c1_i32_31 = arith.constant 1 : i32
      %39 = arith.subi %1, %c1_i32_31 : i32
      %c0_32 = arith.constant 0 : index
      %40 = arith.index_cast %39 : i32 to index
      %c0_33 = arith.constant 0 : index
      %c0_34 = arith.constant 0 : index
      %c0_35 = arith.constant 0 : index
      %41 = vector.load %arg4[%c0_32, %40, %c0_33, %c0_34, %c0_35] : memref<1x4x4x4x8xbf16, #tpu.memory_space<vmem>>, vector<1x1x4x4x8xbf16>
      %42 = vector.shape_cast %41 : vector<1x1x4x4x8xbf16> to vector<1x4x4x8xbf16>
      %43 = vector.shape_cast %42 : vector<1x4x4x8xbf16> to vector<16x8xbf16>
      %cst_36 = arith.constant dense<0.000000e+00> : vector<16x16xf32>
      %44 = tpu.matmul %43, %4, %cst_36 {dimension_numbers = #tpu.dot_dimension_numbers<[1], [0], [0], [1], [0, 0, 1, 1], [], []>} : vector<16x8xbf16>, vector<8x16xbf16>, vector<16x16xf32> -> vector<16x16xf32>
      %cst_37 = arith.constant 0.000000e+00 : f32
      %45 = vector.broadcast %cst_37 : f32 to vector<16x16xf32>
      %46 = arith.maximumf %44, %45 : vector<16x16xf32>
      %47 = arith.mulf %46, %46 : vector<16x16xf32>
      %48 = vector.broadcast %2 : f32 to vector<16x16xf32>
      %49 = arith.mulf %48, %47 : vector<16x16xf32>
      %50 = vector.broadcast %3 : f32 to vector<16x16xf32>
      %51 = arith.addf %49, %50 : vector<16x16xf32>
      %52 = vector.shape_cast %51 : vector<16x16xf32> to vector<1x4x4x16xf32>
      %c0_38 = arith.constant 0 : index
      %c1_39 = arith.constant 1 : index
      %c1_40 = arith.constant 1 : index
      %c0_41 = arith.constant 0 : index
      %53 = vector.load %arg9[%c0_38, %c1_39, %c1_40, %c0_41] : memref<4x6x6x16xf32, #tpu.memory_space<vmem>>, vector<1x4x4x16xf32>
      tpu.vector_store %arg9[%c0_38, %c1_39, %c1_40, %c0_41], %52 {strides = array<i32>} : memref<4x6x6x16xf32, #tpu.memory_space<vmem>>, vector<1x4x4x16xf32>,
    } else {
    }
    %c1_i32 = arith.constant 1 : i32
    %24 = arith.addi %arg1, %c1_i32 : i32
    %c2_i32_17 = arith.constant 2 : i32
    %25 = arith.cmpi slt, %24, %c2_i32_17 : i32
    %26 = arith.extui %25 : i1 to i32
    %c0_i32_18 = arith.constant 0 : i32
    %27 = arith.cmpi ne, %26, %c0_i32_18 : i32
    scf.if %27 {
      %c2_i32_31 = arith.constant 2 : i32
      %39 = arith.addi %1, %c2_i32_31 : i32
      %c0_32 = arith.constant 0 : index
      %40 = arith.index_cast %39 : i32 to index
      %c0_33 = arith.constant 0 : index
      %c0_34 = arith.constant 0 : index
      %c0_35 = arith.constant 0 : index
      %41 = vector.load %arg4[%c0_32, %40, %c0_33, %c0_34, %c0_35] : memref<1x4x4x4x8xbf16, #tpu.memory_space<vmem>>, vector<1x1x4x4x8xbf16>
      %42 = vector.shape_cast %41 : vector<1x1x4x4x8xbf16> to vector<1x4x4x8xbf16>
      %43 = vector.shape_cast %42 : vector<1x4x4x8xbf16> to vector<16x8xbf16>
      %cst_36 = arith.constant dense<0.000000e+00> : vector<16x16xf32>
      %44 = tpu.matmul %43, %4, %cst_36 {dimension_numbers = #tpu.dot_dimension_numbers<[1], [0], [0], [1], [0, 0, 1, 1], [], []>} : vector<16x8xbf16>, vector<8x16xbf16>, vector<16x16xf32> -> vector<16x16xf32>
      %cst_37 = arith.constant 0.000000e+00 : f32
      %45 = vector.broadcast %cst_37 : f32 to vector<16x16xf32>
      %46 = arith.maximumf %44, %45 : vector<16x16xf32>
      %47 = arith.mulf %46, %46 : vector<16x16xf32>
      %48 = vector.broadcast %2 : f32 to vector<16x16xf32>
      %49 = arith.mulf %48, %47 : vector<16x16xf32>
      %50 = vector.broadcast %3 : f32 to vector<16x16xf32>
      %51 = arith.addf %49, %50 : vector<16x16xf32>
      %52 = vector.shape_cast %51 : vector<16x16xf32> to vector<1x4x4x16xf32>
      %c3 = arith.constant 3 : index
      %c1_38 = arith.constant 1 : index
      %c1_39 = arith.constant 1 : index
      %c0_40 = arith.constant 0 : index
      %53 = vector.load %arg9[%c3, %c1_38, %c1_39, %c0_40] : memref<4x6x6x16xf32, #tpu.memory_space<vmem>>, vector<1x4x4x16xf32>
      tpu.vector_store %arg9[%c3, %c1_38, %c1_39, %c0_40], %52 {strides = array<i32>} : memref<4x6x6x16xf32, #tpu.memory_space<vmem>>, vector<1x4x4x16xf32>,
    } else {
    }
    %cst_19 = arith.constant 0.000000e+00 : f32
    %28 = vector.broadcast %cst_19 : f32 to vector<2x4x4x16xf32>
    %c0_i32_20 = arith.constant 0 : i32
    %c3_i32 = arith.constant 3 : i32
    %29 = arith.addi %c0_i32_20, %c3_i32 : i32
    %c1_i32_21 = arith.constant 1 : i32
    %30 = scf.for %arg10 = %c0_i32_20 to %29 step %c1_i32_21 iter_args(%arg11 = %28) -> (vector<2x4x4x16xf32>)  : i32 {
      %39 = arith.index_cast %arg10 : i32 to index
      %c0_31 = arith.constant 0 : index
      %c0_32 = arith.constant 0 : index
      %c0_33 = arith.constant 0 : index
      %40 = vector.load %arg6[%39, %c0_31, %c0_32, %c0_33] : memref<3x3x3x16xf32, #tpu.memory_space<vmem>>, vector<1x3x3x16xf32>
      %41 = vector.shape_cast %40 : vector<1x3x3x16xf32> to vector<3x3x16xf32>
      %42 = arith.index_cast %arg10 : i32 to index
      %c0_34 = arith.constant 0 : index
      %c0_35 = arith.constant 0 : index
      %c0_36 = arith.constant 0 : index
      %43 = vector.load %arg9[%42, %c0_34, %c0_35, %c0_36] : memref<4x6x6x16xf32, #tpu.memory_space<vmem>>, vector<2x4x4x16xf32>
      %44 = vector.extract_strided_slice %41 {offsets = [0, 0, 0], sizes = [1, 1, 16], strides = [1, 1, 1]} : vector<3x3x16xf32> to vector<1x1x16xf32>
      %45 = vector.shape_cast %44 : vector<1x1x16xf32> to vector<16xf32>
      %46 = vector.shape_cast %45 : vector<16xf32> to vector<1x1x1x16xf32>
      %47 = vector.broadcast %46 : vector<1x1x1x16xf32> to vector<2x4x4x16xf32>
      %48 = arith.mulf %43, %47 : vector<2x4x4x16xf32>
      %49 = arith.addf %arg11, %48 : vector<2x4x4x16xf32>
      %50 = arith.index_cast %arg10 : i32 to index
      %c0_37 = arith.constant 0 : index
      %c1_38 = arith.constant 1 : index
      %c0_39 = arith.constant 0 : index
      %51 = vector.load %arg9[%50, %c0_37, %c1_38, %c0_39] : memref<4x6x6x16xf32, #tpu.memory_space<vmem>>, vector<2x4x4x16xf32>
      %52 = vector.extract_strided_slice %41 {offsets = [0, 1, 0], sizes = [1, 1, 16], strides = [1, 1, 1]} : vector<3x3x16xf32> to vector<1x1x16xf32>
      %53 = vector.shape_cast %52 : vector<1x1x16xf32> to vector<16xf32>
      %54 = vector.shape_cast %53 : vector<16xf32> to vector<1x1x1x16xf32>
      %55 = vector.broadcast %54 : vector<1x1x1x16xf32> to vector<2x4x4x16xf32>
      %56 = arith.mulf %51, %55 : vector<2x4x4x16xf32>
      %57 = arith.addf %49, %56 : vector<2x4x4x16xf32>
      %58 = arith.index_cast %arg10 : i32 to index
      %c0_40 = arith.constant 0 : index
      %c2 = arith.constant 2 : index
      %c0_41 = arith.constant 0 : index
      %59 = vector.load %arg9[%58, %c0_40, %c2, %c0_41] : memref<4x6x6x16xf32, #tpu.memory_space<vmem>>, vector<2x4x4x16xf32>
      %60 = vector.extract_strided_slice %41 {offsets = [0, 2, 0], sizes = [1, 1, 16], strides = [1, 1, 1]} : vector<3x3x16xf32> to vector<1x1x16xf32>
      %61 = vector.shape_cast %60 : vector<1x1x16xf32> to vector<16xf32>
      %62 = vector.shape_cast %61 : vector<16xf32> to vector<1x1x1x16xf32>
      %63 = vector.broadcast %62 : vector<1x1x1x16xf32> to vector<2x4x4x16xf32>
      %64 = arith.mulf %59, %63 : vector<2x4x4x16xf32>
      %65 = arith.addf %57, %64 : vector<2x4x4x16xf32>
      %66 = arith.index_cast %arg10 : i32 to index
      %c1_42 = arith.constant 1 : index
      %c0_43 = arith.constant 0 : index
      %c0_44 = arith.constant 0 : index
      %67 = vector.load %arg9[%66, %c1_42, %c0_43, %c0_44] : memref<4x6x6x16xf32, #tpu.memory_space<vmem>>, vector<2x4x4x16xf32>
      %68 = vector.extract_strided_slice %41 {offsets = [1, 0, 0], sizes = [1, 1, 16], strides = [1, 1, 1]} : vector<3x3x16xf32> to vector<1x1x16xf32>
      %69 = vector.shape_cast %68 : vector<1x1x16xf32> to vector<16xf32>
      %70 = vector.shape_cast %69 : vector<16xf32> to vector<1x1x1x16xf32>
      %71 = vector.broadcast %70 : vector<1x1x1x16xf32> to vector<2x4x4x16xf32>
      %72 = arith.mulf %67, %71 : vector<2x4x4x16xf32>
      %73 = arith.addf %65, %72 : vector<2x4x4x16xf32>
      %74 = arith.index_cast %arg10 : i32 to index
      %c1_45 = arith.constant 1 : index
      %c1_46 = arith.constant 1 : index
      %c0_47 = arith.constant 0 : index
      %75 = vector.load %arg9[%74, %c1_45, %c1_46, %c0_47] : memref<4x6x6x16xf32, #tpu.memory_space<vmem>>, vector<2x4x4x16xf32>
      %76 = vector.extract_strided_slice %41 {offsets = [1, 1, 0], sizes = [1, 1, 16], strides = [1, 1, 1]} : vector<3x3x16xf32> to vector<1x1x16xf32>
      %77 = vector.shape_cast %76 : vector<1x1x16xf32> to vector<16xf32>
      %78 = vector.shape_cast %77 : vector<16xf32> to vector<1x1x1x16xf32>
      %79 = vector.broadcast %78 : vector<1x1x1x16xf32> to vector<2x4x4x16xf32>
      %80 = arith.mulf %75, %79 : vector<2x4x4x16xf32>
      %81 = arith.addf %73, %80 : vector<2x4x4x16xf32>
      %82 = arith.index_cast %arg10 : i32 to index
      %c1_48 = arith.constant 1 : index
      %c2_49 = arith.constant 2 : index
      %c0_50 = arith.constant 0 : index
      %83 = vector.load %arg9[%82, %c1_48, %c2_49, %c0_50] : memref<4x6x6x16xf32, #tpu.memory_space<vmem>>, vector<2x4x4x16xf32>
      %84 = vector.extract_strided_slice %41 {offsets = [1, 2, 0], sizes = [1, 1, 16], strides = [1, 1, 1]} : vector<3x3x16xf32> to vector<1x1x16xf32>
      %85 = vector.shape_cast %84 : vector<1x1x16xf32> to vector<16xf32>
      %86 = vector.shape_cast %85 : vector<16xf32> to vector<1x1x1x16xf32>
      %87 = vector.broadcast %86 : vector<1x1x1x16xf32> to vector<2x4x4x16xf32>
      %88 = arith.mulf %83, %87 : vector<2x4x4x16xf32>
      %89 = arith.addf %81, %88 : vector<2x4x4x16xf32>
      %90 = arith.index_cast %arg10 : i32 to index
      %c2_51 = arith.constant 2 : index
      %c0_52 = arith.constant 0 : index
      %c0_53 = arith.constant 0 : index
      %91 = vector.load %arg9[%90, %c2_51, %c0_52, %c0_53] : memref<4x6x6x16xf32, #tpu.memory_space<vmem>>, vector<2x4x4x16xf32>
      %92 = vector.extract_strided_slice %41 {offsets = [2, 0, 0], sizes = [1, 1, 16], strides = [1, 1, 1]} : vector<3x3x16xf32> to vector<1x1x16xf32>
      %93 = vector.shape_cast %92 : vector<1x1x16xf32> to vector<16xf32>
      %94 = vector.shape_cast %93 : vector<16xf32> to vector<1x1x1x16xf32>
      %95 = vector.broadcast %94 : vector<1x1x1x16xf32> to vector<2x4x4x16xf32>
      %96 = arith.mulf %91, %95 : vector<2x4x4x16xf32>
      %97 = arith.addf %89, %96 : vector<2x4x4x16xf32>
      %98 = arith.index_cast %arg10 : i32 to index
      %c2_54 = arith.constant 2 : index
      %c1_55 = arith.constant 1 : index
      %c0_56 = arith.constant 0 : index
      %99 = vector.load %arg9[%98, %c2_54, %c1_55, %c0_56] : memref<4x6x6x16xf32, #tpu.memory_space<vmem>>, vector<2x4x4x16xf32>
      %100 = vector.extract_strided_slice %41 {offsets = [2, 1, 0], sizes = [1, 1, 16], strides = [1, 1, 1]} : vector<3x3x16xf32> to vector<1x1x16xf32>
      %101 = vector.shape_cast %100 : vector<1x1x16xf32> to vector<16xf32>
      %102 = vector.shape_cast %101 : vector<16xf32> to vector<1x1x1x16xf32>
      %103 = vector.broadcast %102 : vector<1x1x1x16xf32> to vector<2x4x4x16xf32>
      %104 = arith.mulf %99, %103 : vector<2x4x4x16xf32>
      %105 = arith.addf %97, %104 : vector<2x4x4x16xf32>
      %106 = arith.index_cast %arg10 : i32 to index
      %c2_57 = arith.constant 2 : index
      %c2_58 = arith.constant 2 : index
      %c0_59 = arith.constant 0 : index
      %107 = vector.load %arg9[%106, %c2_57, %c2_58, %c0_59] : memref<4x6x6x16xf32, #tpu.memory_space<vmem>>, vector<2x4x4x16xf32>
      %108 = vector.extract_strided_slice %41 {offsets = [2, 2, 0], sizes = [1, 1, 16], strides = [1, 1, 1]} : vector<3x3x16xf32> to vector<1x1x16xf32>
      %109 = vector.shape_cast %108 : vector<1x1x16xf32> to vector<16xf32>
      %110 = vector.shape_cast %109 : vector<16xf32> to vector<1x1x1x16xf32>
      %111 = vector.broadcast %110 : vector<1x1x1x16xf32> to vector<2x4x4x16xf32>
      %112 = arith.mulf %107, %111 : vector<2x4x4x16xf32>
      %113 = arith.addf %105, %112 : vector<2x4x4x16xf32>
      scf.yield %113 : vector<2x4x4x16xf32>
    }
    %c3_i32_22 = arith.constant 3 : i32
    %31 = vector.shape_cast %30 : vector<2x4x4x16xf32> to vector<32x16xf32>
    %32 = arith.truncf %31 : vector<32x16xf32> to vector<32x16xbf16>
    %c0_23 = arith.constant 0 : index
    %c0_24 = arith.constant 0 : index
    %33 = vector.load %arg7[%c0_23, %c0_24] : memref<16x8xbf16, #tpu.memory_space<vmem>>, vector<16x8xbf16>
    %cst_25 = arith.constant dense<0.000000e+00> : vector<32x8xf32>
    %34 = tpu.matmul %32, %33, %cst_25 {dimension_numbers = #tpu.dot_dimension_numbers<[1], [0], [0], [1], [0, 0, 1, 1], [], []>} : vector<32x16xbf16>, vector<16x8xbf16>, vector<32x8xf32> -> vector<32x8xf32>
    %35 = vector.shape_cast %34 : vector<32x8xf32> to vector<2x4x4x8xf32>
    %c0_26 = arith.constant 0 : index
    %c0_27 = arith.constant 0 : index
    %c0_28 = arith.constant 0 : index
    %c0_29 = arith.constant 0 : index
    %c0_30 = arith.constant 0 : index
    %36 = vector.load %arg8[%c0_26, %c0_27, %c0_28, %c0_29, %c0_30] : memref<1x2x4x4x8xf32, #tpu.memory_space<vmem>>, vector<1x2x4x4x8xf32>
    %37 = vector.shape_cast %36 : vector<1x2x4x4x8xf32> to vector<2x4x4x8xf32>
    %38 = vector.shape_cast %35 : vector<2x4x4x8xf32> to vector<1x2x4x4x8xf32>
    tpu.vector_store %arg8[%c0_26, %c0_27, %c0_28, %c0_29, %c0_30], %38 {strides = array<i32>} : memref<1x2x4x4x8xf32, #tpu.memory_space<vmem>>, vector<1x2x4x4x8xf32>,
    return
  }
  func.func @transform_0(%arg0: i32, %arg1: i32) -> i32 {
    %c0_i32 = arith.constant 0 : i32
    %c0_i32_0 = arith.constant 0 : i32
    return %c0_i32 : i32
  }
  func.func @transform_1(%arg0: i32, %arg1: i32) -> i32 {
    %c0_i32 = arith.constant 0 : i32
    %c0_i32_0 = arith.constant 0 : i32
    return %c0_i32 : i32
  }
  func.func @transform_2(%arg0: i32, %arg1: i32) -> (i32, i32, i32, i32, i32) {
    %c0_i32 = arith.constant 0 : i32
    %c0_i32_0 = arith.constant 0 : i32
    %c0_i32_1 = arith.constant 0 : i32
    %c0_i32_2 = arith.constant 0 : i32
    %c0_i32_3 = arith.constant 0 : i32
    return %arg0, %c0_i32, %c0_i32_0, %c0_i32_1, %c0_i32_2 : i32, i32, i32, i32, i32
  }
  func.func @transform_3(%arg0: i32, %arg1: i32) -> (i32, i32) {
    %c0_i32 = arith.constant 0 : i32
    %c0_i32_0 = arith.constant 0 : i32
    %c0_i32_1 = arith.constant 0 : i32
    return %c0_i32, %c0_i32_0 : i32, i32
  }
  func.func @transform_4(%arg0: i32, %arg1: i32) -> (i32, i32, i32, i32) {
    %c0_i32 = arith.constant 0 : i32
    %c0_i32_0 = arith.constant 0 : i32
    %c0_i32_1 = arith.constant 0 : i32
    %c0_i32_2 = arith.constant 0 : i32
    %c0_i32_3 = arith.constant 0 : i32
    return %c0_i32, %c0_i32_0, %c0_i32_1, %c0_i32_2 : i32, i32, i32, i32
  }
  func.func @transform_5(%arg0: i32, %arg1: i32) -> (i32, i32) {
    %c0_i32 = arith.constant 0 : i32
    %c0_i32_0 = arith.constant 0 : i32
    %c0_i32_1 = arith.constant 0 : i32
    return %c0_i32, %c0_i32_0 : i32, i32
  }
  func.func @transform_6(%arg0: i32, %arg1: i32) -> (i32, i32, i32, i32, i32) {
    %c0_i32 = arith.constant 0 : i32
    %c0_i32_0 = arith.constant 0 : i32
    %c0_i32_1 = arith.constant 0 : i32
    %c0_i32_2 = arith.constant 0 : i32
    return %arg0, %arg1, %c0_i32, %c0_i32_0, %c0_i32_1 : i32, i32, i32, i32, i32
  }
}

</mosaic_0001>

<bundles_post_ra>
// kernel: tpu_custom_call.1
= control target key start
LH: loop header
LB: loop body
LE: loop exit
PB: predicated region body
PF: predicated region fallthrough
CT: control target
= control target key end

     0   :  { %s2135_s0 = inlined_call_operand.<no memory space> [shape: f32[1], index: 0, kind: input, shape index: {}]   ;;  %s2136_s1 = inlined_call_operand.<no memory space> [shape: f32[1], index: 1, kind: input, shape index: {}]   ;;  %s2137_s2 = inlined_call_operand.hbm [shape: bf16[2,4,4,4,8], index: 2, kind: input, shape index: {}]   ;;  %s2138_s3 = inlined_call_operand.vmem [shape: bf16[8,16], index: 3, kind: input, shape index: {}]   ;;  %s2139_s4 = inlined_call_operand.hbm [shape: f32[3,3,3,16], index: 4, kind: input, shape index: {}]   ;;  %s2140_s5 = inlined_call_operand.vmem [shape: bf16[16,8], index: 5, kind: input, shape index: {}]   ;;  %s2141_s6 = inlined_call_operand.hbm [shape: f32[2,4,4,4,8], index: 6, kind: output, shape index: {}]  }
   0x1   :  { %2150 = sst [smem:[#allocation21_spill]] %s2139_s4 }
   0x2   :  { %2151 = sst [smem:[#allocation22_spill]] %s2141_s6 }
   0x3   :  { %11 = sst [smem:[#allocation3]] %s2135_s0 }
   0x4   :  { %12 = sst [smem:[#allocation4]] %s2136_s1 }
   0x5   :  { %13 = vsyncpa [#allocation6], 0 }
   0x6   :  { %15 = vsyncpa [#allocation6 + $0x1], 0 }
   0x7   :  { %16 = vsyncpa [#allocation9], 0 }
   0x8   :  { %17 = vsyncpa [#allocation7], 0 }
   0x9   :  { %19 = vsyncpa [#allocation7 + $0x1], 0  ;;  %s1661_s25 = smov 0   ;;  %s1663_s26 = smov 0  }
   0xa   :  { %s1665_s27 = smov 0   ;;  %s1667_s28 = smov 0  }
   0xb   :  { %s1669_s29 = smov 0   ;;  %s1671_s0 = smov 0  }
   0xc   :  { %s1673_s30 = smov 0   ;;  %s1675_s1 = smov 0  }
   0xd   :  { %s1677_s7 = smov 0   ;;  %s1679_s8 = smov 0  }
   0xe   :  { %s1681_s9 = smov 0  }
   0xf LB: > { %2152 = sst [smem:[#allocation14_spill]] %s1534_s25  ;;  %s1060_s10 = sadd.s32 4294967295, %s1574_s9   ;;  %s1574_s9 = sphi %s1681_s9, %s25_s9   ;;  %s1570_s8 = sphi %s1679_s8, %s2189_s8   ;;  %s1566_s7 = sphi %s1677_s7, %s2180_s7   ;;  %s1562_s1 = sphi %s1675_s1, %s2188_s1   ;;  %s1558_s30 = sphi %s1673_s30, %s2179_s30   ;;  %s1554_s0 = sphi %s1671_s0, %s2187_s0   ;;  %s1550_s29 = sphi %s1669_s29, %s2186_s29   ;;  %s1546_s28 = sphi %s1667_s28, %s2185_s28   ;;  %s1542_s27 = sphi %s1665_s27, %s2184_s27   ;;  %s1538_s26 = sphi %s1663_s26, %s2183_s26   ;;  %s1534_s25 = sphi %s1661_s25, %s2182_s25  }
  0x10   : > { %2153 = sst [smem:[#allocation15_spill]] %s1562_s1  ;;  %s1061_s11 = sadd.s32 4294967294, %s1574_s9  }
  0x11   : > { %2154 = sst [smem:[#allocation16_spill]] %s1566_s7  ;;  %p99_p0 = scmp.ne.s32.totalorder %s1550_s29, %s1546_s28 }
  0x12   : > { %p1717_p1 = scmp.eq.s32.totalorder %s1060_s10, 0  ;;  %p187_p2 = scmp.ne.s32.totalorder %s1542_s27, %s1538_s26 }
  0x13   : > { %p188_p3 = scmp.eq.s32.totalorder %s1060_s10, 3  ;;  %p193_p5 = scmp.ne.s32.totalorder %s1538_s26, %s1534_s25 }
  0x14   : > { %p1725_p4 = por %p1717_p1, %p99_p0  ;;  %p194_p7 = scmp.eq.s32.totalorder %s1061_s11, 3 }
  0x15   : > { %p1731_p6 = por %p188_p3, %p187_p2  ;;  %p1062_p8 = scmp.ge.s32.totalorder %s1574_s9, 1 }
  0x16   : > { %p201_p9 = scmp.lt.s32.totalorder %s1574_s9, 5  ;;  %p1737_p10 = por %p194_p7, %p193_p5 }
  0x17   : > { %s2157_s14 = scalar_select %p1731_p6, 1, 0 }
  0x18   : > { %s2159_s15 = scalar_select %p1737_p10, 1, 0 }
  0x19   : > { %2158 = sst [smem:[#allocation17_spill]] %s2157_s14  ;;  %p1741_p11 = pnand %p1062_p8, %p201_p9 }
  0x1a   : > { %2160 = sst [smem:[#allocation18_spill]] %s2159_s15  ;;  %s1612_s20 = smov [#allocation8]  }
  0x1b   : > { %s2162_s4 = sld [smem:[#allocation21_spill]]  ;;  %p1168_p12 = pneg %p1741_p11 }
  0x1c   : > { %s223_s21 = sshll.u32 %s1612_s20, 4  ;;  %s1613_s22 = smov 64   ;;  %s224_s21 = int_to_ptr.vmem [resolvable:$true] %s223_s21 }
  0x1d   : > { %p1169_p13 = pnand %p1168_p12, %p1717_p1  ;;  %s1614_s23 = smov 4  }
  0x1e   : > { %s34_s24 = sadd.s32 1, %s1566_s7  ;;  %s37_s28 = sadd.s32 1, %s1570_s8 }
  0x1f   : > { %p35_p0 = scmp.ge.s32.totalorder %s34_s24, 2  ;;  %s86_s10 = sadd.s32 1, %s1554_s0 }
  0x20   : > { %p93_p2 = scmp.ne.s32.totalorder %s1554_s0, %s1550_s29  ;;  %p94_p3 = scmp.eq.s32.totalorder %s1574_s9, 0 }
  0x21   : > { %s221_s19 = sshll.u32 %s2162_s4, 4  ;;  %s2191_s24 = smov (%p35_p0, %s34_s24), 0  ;;  %s222_s19 = int_to_ptr.hbm [resolvable:$true] %s221_s19 }
  0x22   : > { %1171 = dma.hbm_to_vmem [thread:$0]  (!%p1169_p13), %s222_s19, 576, %s224_s21, [#allocation9], %s1613_s22, %s1613_s22, %s1614_s23  }
  0x23   : > { %2163 = sst [smem:[#allocation19_spill]] %s2191_s24  ;;  %s2193_s28 = smov (!%p35_p0, %s37_s28), %s1570_s8 }
  0x24   : > { %p1761_p5 = por %p94_p3, %p93_p2  ;;  %s173_s17 = ssub.s32 %s1566_s7, %s2191_s24 }
  0x25   : > { %p39_p7 = scmp.ge.s32.totalorder %s2193_s28, 2  ;;  %s177_s18 = sadd.s32 1, %s1542_s27 }
  0x26   : > { %p1181_p8 = scmp.lt.s32.totalorder %s1574_s9, 4  ;;  %s240_s19 = sand.u32 1, %s1554_s0  }
  0x27   : > { %s2195_s28 = smov (%p39_p7, %s2193_s28), 0  ;;  %s1065_s20 = sshll.u32 %s240_s19, 5 }
  0x28   : > { %2165 = sst [smem:[#allocation20_spill]] %s2195_s28  ;;  %s83_s21 = ssub.s32 %s1570_s8, %s2195_s28 }
  0x29   : > { %p84_p9 = scmp.eq.s32.totalorder %s83_s21, 0  ;;  %s174_s22 = sor.u32 %s173_s17, %s83_s21 }
  0x2a   : > { %p175_p12 = scmp.eq.s32.totalorder %s174_s22, 0  ;;  %s1151_s23 = sshll.u32 %s1570_s8, 5 }
  0x2b   : > { %s1776_s4 = scalar_select %p84_p9, %s1554_s0, %s86_s10  }
  0x2c   : > { %s1779_s15 = scalar_select %p175_p12, %s1542_s27, %s177_s18  }
  0x2d   : > { %s249_s25 = scalar_lea.hbm %s2137_s2, %s1151_s23  ;;  %s244_s14 = scalar_lea.vmem [#allocation5], %s1065_s20 }
  0x2e   : > { %s252_s6 = sshll.u32 %s244_s14, 4  ;;  %s250_s1 = sshll.u32 %s249_s25, 4  ;;  %s253_s6 = int_to_ptr.vmem [resolvable:$true] %s252_s6  ;;  %s251_s1 = int_to_ptr.hbm [resolvable:$true] %s250_s1 }
  0x2f   : > { %p1173_p13 = pnand %p1181_p8, %p1761_p5  ;;  %s241_s28 = scalar_lea.sflag [#allocation6], %s240_s19 }
  0x30   : > { %s1615_s17 = smov 32   ;;  %s1616_s21 = smov 2  }
  0x31   : > { %1175 = dma.hbm_to_vmem [thread:$0]  (!%p1173_p13), %s251_s1, 512, %s253_s6, %s241_s28, %s1615_s17, %s1615_s17, %s1616_s21  }
  0x32   : > { %264 = sbr.rel (%p1741_p11) target bundleno = 749 (0x2ed), region = 44  ;;  %s266_s10 = sand.u32 (!%p1741_p11), 1, %s1550_s29  }
  0x33   : > { %s1791_s7 = sshll.u32 (!%p1741_p11), %s266_s10, 5  ;;  %s267_s14 = scalar_lea.sflag (!%p1741_p11), [#allocation6], %s266_s10 }
  0x34   : > { %s270_s25 = scalar_lea.vmem (!%p1741_p11), [#allocation5], %s1791_s7 }
  0x37   : > { %1521 = dma.done.wait (%p1725_p4), %s267_s14, 512  }
  0x38   : > { %1523 = vsyncadd (%p1725_p4), %s267_s14, 4294966784 }
  0x39   : > { %1525 = dma.done.wait (%p1717_p1), [#allocation9], 576  }
  0x3a   : > { %1527 = vsyncadd (%p1717_p1), [#allocation9], 4294966720  ;;  %s302_s6 = sand.u32 1, %s1538_s26   ;;  %s1072_s1 = sshll.u32 %s1558_s30, 1  ;;  %vm311_vm0 = vcmask 128000   ;;  %v1617_v0 = vmov 0.0  }
  0x3b   : > { %s1806_s16 = sshll.u32 %s302_s6, 5  ;;  %s1153_s24 = sshll.u32 %s1558_s30, 4  ;;  %312 = vst.msk [vmem:[#allocation2] sm:$0x3f] %vm311_vm0, %v1617_v0  ;;  %vm377_vm1 = vcmask 1043456   ;;  %vm372_vm2 = vcmask 64512  }
  0x3c   : > { %313 = vst.msk [vmem:[#allocation2 + $0x8] sm:$0x3f] %vm311_vm0, %v1617_v0  ;;  %s1813_s12 = scalar_lea.vmem %s270_s25, %s1153_s24 [#allocation5]  ;;  %v310_v1 = vld [vmem:[%s2138_s3] sm:$0xf]  ;;  %s308_s11 = sld [smem:[#allocation3]]  ;;  %vm431_vm3 = vcmask 125952  }
  0x3d   : > { %314 = vst.msk [vmem:[#allocation2 + $0x10] sm:$0x3f] %vm311_vm0, %v1617_v0  ;;  %v339_v2 = vld [vmem:[%s1813_s12] sm:$0x3]  ;;  %v340_v3 = vld [vmem:[%s1813_s12 + $0x2] sm:$0x3] }
  0x3e   : > { %315 = vst.msk [vmem:[#allocation2 + $0x18] sm:$0x3f] %vm311_vm0, %v1617_v0  ;;  %v1823_v4 = vsel %vm377_vm1, %v310_v1, 0  ;;  %v341_v5 = vld [vmem:[%s1813_s12 + $0x4] sm:$0x3]  ;;  %s309_s18 = sld [smem:[#allocation4]] }
  0x3f   : > { %316 = vst.msk [vmem:[#allocation2 + $0x20] sm:$0x3f] %vm311_vm0, %v1617_v0  ;;  %388 = vmatpush.bf16.msra.mxu0 %v1823_v4  ;;  %1158 = vmatpush.bf16.msra.mxu1 %v1823_v4  ;;  %v342_v6 = vld [vmem:[%s1813_s12 + $0x6] sm:$0x3]  ;;  %v343_v7 = vld [vmem:[%s1813_s12 + $0x8] sm:$0x3] }
  0x40   : > { %348 = vst [vmem:[#allocation1] ss:$4 sm:$0xff] %v339_v2  ;;  %v344_v8 = vld [vmem:[%s1813_s12 + $0xa] sm:$0x3]  ;;  %v345_v9 = vld [vmem:[%s1813_s12 + $0xc] sm:$0x3] }
  0x41   : > { %351 = vst [vmem:[#allocation1 + $0x1] ss:$4 sm:$0xff] %v340_v3  ;;  %v346_v10 = vld [vmem:[%s1813_s12 + $0xe] sm:$0x3]  ;;  %s1875_s19 = scalar_lea.vmem [#allocation10], %s1806_s16  ;;  %p1077_p1 = scmp.le.s32.totalorder %s1558_s30, 0 }
  0x42   : > { %354 = vst [vmem:[#allocation1 + $0x2] ss:$4 sm:$0xff] %v341_v5  ;;  %v1854_v15 = vstv %s308_s11  ;;  %s1078_s20 = sadd.s32 (!%p1077_p1), 4294967295, %s1072_s1 }
  0x43   : > { %357 = vst [vmem:[#allocation1 + $0x3] ss:$4 sm:$0xff] %v342_v6  ;;  %s1154_s22 = sshll.u32 (!%p1077_p1), %s1078_s20, 3 }
  0x44   : > { %360 = vst [vmem:[#allocation1 + $0x20] ss:$4 sm:$0xff] %v343_v7  ;;  %v1856_v17 = vstv %s309_s18  ;;  %s447_s23 = scalar_lea.vmem (!%p1077_p1), %s270_s25, %s1154_s22 [#allocation5] }
  0x45   : > { %363 = vst [vmem:[#allocation1 + $0x21] ss:$4 sm:$0xff] %v344_v8 }
  0x46   : > { %366 = vst [vmem:[#allocation1 + $0x22] ss:$4 sm:$0xff] %v345_v9 }
  0x47   : > { %369 = vst [vmem:[#allocation1 + $0x23] ss:$4 sm:$0xff] %v346_v10 }
  0x48   : > { %317 = vst.msk [vmem:[#allocation2 + $0x28] sm:$0x3f] %vm311_vm0, %v1617_v0 }
  0x49   : > { %318 = vst.msk [vmem:[#allocation2 + $0x30] sm:$0x3f] %vm311_vm0, %v1617_v0 }
  0x4a   : > { %v370_v11 = vld.sshfl [vmem:[#allocation1] sm:$0xff pattern:$0x73625140]  ;;  %319 = vst.msk [vmem:[#allocation2 + $0x38] sm:$0x3f] %vm311_vm0, %v1617_v0 }
  0x4b   : > { %1075 = vmatmul.msk.bf16.vlgmr.msra.gmra.mxu0 %vm372_vm2, %v370_v11  ;;  %320 = vst.msk [vmem:[#allocation2 + $0x40] sm:$0x3f] %vm311_vm0, %v1617_v0 }
  0x4c   : > { %323 = vst.msk [vmem:[#allocation2 + $0x58] sm:$0x3f] %vm311_vm0, %v1617_v0 }
  0x4d   : > { %324 = vst.msk [vmem:[#allocation2 + $0x60] sm:$0x3f] %vm311_vm0, %v1617_v0 }
  0x4e   : > { %v371_v12 = vld.sshfl [vmem:[#allocation1 + $0x20] sm:$0xff pattern:$0x73625140]  ;;  %329 = vst.msk [vmem:[#allocation2 + $0x88] sm:$0x3f] %vm311_vm0, %v1617_v0 }
  0x4f   : > { %1076 = vmatmul.msk.bf16.vlgmr.msra.gmra.mxu1 %vm372_vm2, %v371_v12  ;;  %330 = vst.msk [vmem:[#allocation2 + $0x90] sm:$0x3f] %vm311_vm0, %v1617_v0 }
  0x50   : > { %331 = vst.msk [vmem:[#allocation2 + $0x98] sm:$0x3f] %vm311_vm0, %v1617_v0 }
  0x51   : > { %332 = vst.msk [vmem:[#allocation2 + $0xa0] sm:$0x3f] %vm311_vm0, %v1617_v0 }
  0x52   : > { %333 = vst.msk [vmem:[#allocation2 + $0xa8] sm:$0x3f] %vm311_vm0, %v1617_v0 }
  0x53   : > { %334 = vst.msk [vmem:[#allocation2 + $0xb0] sm:$0x3f] %vm311_vm0, %v1617_v0 }
  0x54   : > { %335 = vst.msk [vmem:[#allocation2 + $0xb8] sm:$0x3f] %vm311_vm0, %v1617_v0 }
  0x55   : > { %321 = vst.msk [vmem:[#allocation2 + $0x48] sm:$0x3f] %vm311_vm0, %v1617_v0 }
  0x56   : > { %322 = vst.msk [vmem:[#allocation2 + $0x50] sm:$0x3f] %vm311_vm0, %v1617_v0 }
  0x57   : > { %325 = vst.msk [vmem:[#allocation2 + $0x68] sm:$0x3f] %vm311_vm0, %v1617_v0 }
  0x58   : > { %326 = vst.msk [vmem:[#allocation2 + $0x70] sm:$0x3f] %vm311_vm0, %v1617_v0 }
  0x59   : > { %327 = vst.msk [vmem:[#allocation2 + $0x78] sm:$0x3f] %vm311_vm0, %v1617_v0 }
  0x5a   : > { %328 = vst.msk [vmem:[#allocation2 + $0x80] sm:$0x3f] %vm311_vm0, %v1617_v0 }
  0xc8   : > { %v390_v13 = vpop.f32.mrf.mxu0 }
  0xc9   : > { %v400_v14 = vmax.f32 %v390_v13, 0.0 }
  0xcb   : > { %v404_v16 = vmul.f32 %v400_v14, %v400_v14 }
  0xcc   : > { %v395_v18 = vpop.f32.mrf.mxu1 }
  0xcd   : > { %v409_v19 = vmul.f32 %v1854_v15, %v404_v16  ;;  %v402_v20 = vmax.f32 %v395_v18, 0.0 }
  0xcf   : > { %v414_v21 = vadd.f32 %v1856_v17, %v409_v19  ;;  %v406_v22 = vmul.f32 %v402_v20, %v402_v20 }
  0xd0   : > { %v392_v23 = vpop.f32.mrf.mxu0 }
  0xd1   : > { %v422_v24 = vrot.slane %v414_v21, 4  ;;  %432 = vst.msk [vmem:[#allocation2 + $0x39] sm:$0xf] %vm431_vm3, %v414_v21  ;;  %v411_v25 = vmul.f32 %v1854_v15, %v406_v22  ;;  %v401_v26 = vmax.f32 %v392_v23, 0.0 }
  0xd3   : > { %433 = vst.msk [vmem:[#allocation2 + $0x41] sm:$0xf] %vm431_vm3, %v422_v24  ;;  %v416_v27 = vadd.f32 %v1856_v17, %v411_v25  ;;  %v405_v28 = vmul.f32 %v401_v26, %v401_v26 }
  0xd4   : > { %v397_v29 = vpop.f32.mrf.mxu1 }
  0xd5   : > { %v424_v30 = vrot.slane %v416_v27, 4  ;;  %436 = vst.msk [vmem:[#allocation2 + $0x69] sm:$0xf] %vm431_vm3, %v416_v27  ;;  %v410_v31 = vmul.f32 %v1854_v15, %v405_v28  ;;  %v403_v32 = vmax.f32 %v397_v29, 0.0 }
  0xd7   : > { %437 = vst.msk [vmem:[#allocation2 + $0x71] sm:$0xf] %vm431_vm3, %v424_v30  ;;  %v415_v33 = vadd.f32 %v1856_v17, %v410_v31  ;;  %v407_v34 = vmul.f32 %v403_v32, %v403_v32 }
  0xd9   : > { %v423_v35 = vrot.slane %v415_v33, 4  ;;  %434 = vst.msk [vmem:[#allocation2 + $0x49] sm:$0xf] %vm431_vm3, %v415_v33  ;;  %v412_v36 = vmul.f32 %v1854_v15, %v407_v34 }
  0xdb   : > { %435 = vst.msk [vmem:[#allocation2 + $0x51] sm:$0xf] %vm431_vm3, %v423_v35  ;;  %v417_v37 = vadd.f32 %v1856_v17, %v412_v36  ;;  %443 = sbr.rel (%p1077_p1) target bundleno = 381 (0x17d), region = 56 }
  0xdd   : > { %v425_v38 = vrot.slane %v417_v37, 4  ;;  %438 = vst.msk [vmem:[#allocation2 + $0x79] sm:$0xf] %vm431_vm3, %v417_v37 }
  0xdf   : > { %439 = vst.msk [vmem:[#allocation2 + $0x81] sm:$0xf] %vm431_vm3, %v425_v38 }
  0xe0   : > { %473 = vmatpush.bf16.msra.mxu0 %v1823_v4  ;;  %v448_v39 = vld [vmem:[%s447_s23] sm:$0x3]  ;;  %v449_v40 = vld [vmem:[%s447_s23 + $0x2] sm:$0x3]  ;;  %v450_v41 = vld [vmem:[%s447_s23 + $0x4] sm:$0x3] }
  0xe1   : > { %v451_v42 = vld [vmem:[%s447_s23 + $0x6] sm:$0x3]  ;;  %453 = vst [vmem:[#allocation1] ss:$4 sm:$0xff] %v448_v39 }
  0xe2   : > { %456 = vst [vmem:[#allocation1 + $0x1] ss:$4 sm:$0xff] %v449_v40 }
  0xe3   : > { %459 = vst [vmem:[#allocation1 + $0x2] ss:$4 sm:$0xff] %v450_v41 }
  0xe4   : > { %462 = vst [vmem:[#allocation1 + $0x3] ss:$4 sm:$0xff] %v451_v42 }
  0xeb   : > { %v463_v43 = vld.sshfl [vmem:[#allocation1] sm:$0xff pattern:$0x73625140] }
  0xec   : > { %1081 = vmatmul.msk.bf16.vlgmr.msra.gmra.mxu0 %vm372_vm2, %v463_v43 }
 0x169   : > { %v475_v44 = vpop.f32.mrf.mxu0 }
 0x16a   : > { %v480_v45 = vmax.f32 %v475_v44, 0.0 }
 0x16c   : > { %v482_v46 = vmul.f32 %v480_v45, %v480_v45 }
 0x16e   : > { %v484_v47 = vmul.f32 %v482_v46, %v1854_v15 }
 0x170   : > { %v486_v48 = vadd.f32 %v484_v47, %v1856_v17 }
 0x171   : > { %v477_v49 = vpop.f32.mrf.mxu0 }
 0x172   : > { %v490_v50 = vrot.slane %v486_v48, 4  ;;  %495 = vst.msk [vmem:[#allocation2 + $0x9] sm:$0xf] %vm431_vm3, %v486_v48  ;;  %v481_v51 = vmax.f32 %v477_v49, 0.0 }
 0x174   : > { %496 = vst.msk [vmem:[#allocation2 + $0x11] sm:$0xf] %vm431_vm3, %v490_v50  ;;  %v483_v52 = vmul.f32 %v481_v51, %v481_v51 }
 0x176   : > { %v485_v53 = vmul.f32 %v483_v52, %v1854_v15 }
 0x178   : > { %v487_v54 = vadd.f32 %v485_v53, %v1856_v17 }
 0x17a   : > { %v491_v55 = vrot.slane %v487_v54, 4  ;;  %497 = vst.msk [vmem:[#allocation2 + $0x19] sm:$0xf] %vm431_vm3, %v487_v54 }
 0x17c   : > { %498 = vst.msk [vmem:[#allocation2 + $0x21] sm:$0xf] %vm431_vm3, %v491_v55 }
 0x17d PF: > { %s499_s17 = sadd.s32 1, %s1558_s30 }
 0x17e   : > { %p1082_p4 = scmp.ge.s32.totalorder %s499_s17, 2 }
 0x180   : > { %503 = sbr.rel (%p1082_p4) target bundleno = 546 (0x222), region = 60 }
 0x185   : > { %533 = vmatpush.bf16.msra.mxu0 %v1823_v4  ;;  %v1085_v56 = vld [vmem:[%s1813_s12 + $0x10] sm:$0x3]  ;;  %v1086_v57 = vld [vmem:[%s1813_s12 + $0x12] sm:$0x3]  ;;  %v1087_v58 = vld [vmem:[%s1813_s12 + $0x14] sm:$0x3] }
 0x186   : > { %v1088_v59 = vld [vmem:[%s1813_s12 + $0x16] sm:$0x3]  ;;  %513 = vst [vmem:[#allocation1] ss:$4 sm:$0xff] %v1085_v56 }
 0x187   : > { %516 = vst [vmem:[#allocation1 + $0x1] ss:$4 sm:$0xff] %v1086_v57 }
 0x188   : > { %519 = vst [vmem:[#allocation1 + $0x2] ss:$4 sm:$0xff] %v1087_v58 }
 0x189   : > { %522 = vst [vmem:[#allocation1 + $0x3] ss:$4 sm:$0xff] %v1088_v59 }
 0x190   : > { %v523_v60 = vld.sshfl [vmem:[#allocation1] sm:$0xff pattern:$0x73625140] }
 0x191   : > { %1089 = vmatmul.msk.bf16.vlgmr.msra.gmra.mxu0 %vm372_vm2, %v523_v60 }
 0x20e   : > { %v535_v61 = vpop.f32.mrf.mxu0 }
 0x20f   : > { %v540_v62 = vmax.f32 %v535_v61, 0.0 }
 0x211   : > { %v542_v63 = vmul.f32 %v540_v62, %v540_v62 }
 0x213   : > { %v544_v0 = vmul.f32 %v542_v63, %v1854_v15 }
 0x215   : > { %v546_v1 = vadd.f32 %v544_v0, %v1856_v17 }
 0x216   : > { %v537_v2 = vpop.f32.mrf.mxu0 }
 0x217   : > { %v550_v3 = vrot.slane %v546_v1, 4  ;;  %555 = vst.msk [vmem:[#allocation2 + $0x99] sm:$0xf] %vm431_vm3, %v546_v1  ;;  %v541_v4 = vmax.f32 %v537_v2, 0.0 }
 0x219   : > { %556 = vst.msk [vmem:[#allocation2 + $0xa1] sm:$0xf] %vm431_vm3, %v550_v3  ;;  %v543_v5 = vmul.f32 %v541_v4, %v541_v4 }
 0x21b   : > { %v545_v6 = vmul.f32 %v543_v5, %v1854_v15 }
 0x21d   : > { %v547_v7 = vadd.f32 %v545_v6, %v1856_v17 }
 0x21f   : > { %v551_v8 = vrot.slane %v547_v7, 4  ;;  %557 = vst.msk [vmem:[#allocation2 + $0xa9] sm:$0xf] %vm431_vm3, %v547_v7 }
 0x221   : > { %558 = vst.msk [vmem:[#allocation2 + $0xb1] sm:$0xf] %vm431_vm3, %v551_v8 }
 0x222 PF: > { %v1907_v9 = vmov 0.0   ;;  %v1909_v10 = vmov 0.0   ;;  %v1911_v11 = vmov 0.0   ;;  %v1913_v12 = vmov 0.0   ;;  %s1923_s21 = smov 0  }
 0x223   : > { %v1915_v13 = vmov 0.0   ;;  %v1917_v14 = vmov 0.0   ;;  %v1919_v15 = vmov 0.0   ;;  %v1921_v16 = vmov 0.0  }
 0x224 LB: >> { %s573_s10 = smul.u32 12, %s1610_s21  ;;  %s1610_s21 = sphi %s1923_s21, %s564_s21   ;;  %v1606_v16 = vphi %v1921_v16, %v2173_v16   ;;  %v1602_v15 = vphi %v1919_v15, %v2172_v15   ;;  %v1598_v14 = vphi %v1917_v14, %v2171_v14   ;;  %v1594_v13 = vphi %v1915_v13, %v2170_v13   ;;  %v1590_v12 = vphi %v1913_v12, %v2169_v12   ;;  %v1586_v11 = vphi %v1911_v11, %v2168_v11   ;;  %v1582_v10 = vphi %v1909_v10, %v2167_v10   ;;  %v1578_v9 = vphi %v1907_v9, %v2166_v9  }
 0x225   : >> { %s578_s7 = smul.u32 48, %s1610_s21  ;;  %s564_s21 = sadd.s32 1, %s1610_s21  }
 0x226   : >> { %s1938_s14 = scalar_lea.vmem [#allocation8], %s573_s10  ;;  %p561_p11 = scmp.ge.s32.totalorder %s564_s21, 3  }
 0x227   : >> { %v575_v17 = vld [vmem:[%s1938_s14] sm:$0x7]  ;;  %v1942_v18 = vld [vmem:[%s1938_s14 + $0x4] sm:$0x7]  ;;  %s1949_s25 = scalar_lea.vmem [#allocation2], %s578_s7  ;;  %s2174_s24 = sld [smem:[#allocation15_spill]] (%p561_p11) }
 0x228   : >> { %v588_v19 = vperm.slane %v575_v17, 0  ;;  %v613_v20 = vperm.slane %v575_v17, 1  ;;  %v1944_v21 = vperm.slane %v575_v17, 2  ;;  %v1947_v22 = vperm.slane %v1942_v18, 0  ;;  %v580_v23 = vld [vmem:[%s1949_s25] sm:$0xf] }
 0x229   : >> { %v581_v24 = vld [vmem:[%s1949_s25 + $0x8] sm:$0xf]  ;;  %v582_v25 = vld [vmem:[%s1949_s25 + $0x10] sm:$0xf]  ;;  %v583_v26 = vld [vmem:[%s1949_s25 + $0x18] sm:$0xf] }
 0x22a   : >> { %v584_v27 = vld [vmem:[%s1949_s25 + $0x30] sm:$0xf]  ;;  %v585_v28 = vld [vmem:[%s1949_s25 + $0x38] sm:$0xf]  ;;  %v589_v29 = vmul.f32 %v588_v19, %v580_v23  ;;  %v590_v30 = vmul.f32 %v588_v19, %v581_v24  ;;  %v591_v31 = vmul.f32 %v588_v19, %v582_v25  ;;  %v586_v32 = vld [vmem:[%s1949_s25 + $0x40] sm:$0xf]  ;;  %v592_v34 = vmul.f32 %v588_v19, %v583_v26 }
 0x22b   : >> { %v587_v33 = vld [vmem:[%s1949_s25 + $0x48] sm:$0xf]  ;;  %v593_v35 = vmul.f32 %v588_v19, %v584_v27  ;;  %v594_v36 = vmul.f32 %v588_v19, %v585_v28  ;;  %v605_v37 = vld [vmem:[%s1949_s25 + $0x1] sm:$0xf]  ;;  %v595_v38 = vmul.f32 %v588_v19, %v586_v32  ;;  %v607_v43 = vld [vmem:[%s1949_s25 + $0x11] sm:$0xf] }
 0x22c   : >> { %v596_v39 = vmul.f32 %v588_v19, %v587_v33  ;;  %v597_v40 = vadd.f32 %v1606_v16, %v589_v29  ;;  %v598_v41 = vadd.f32 %v1602_v15, %v590_v30  ;;  %v606_v42 = vld [vmem:[%s1949_s25 + $0x9] sm:$0xf]  ;;  %v608_v44 = vld [vmem:[%s1949_s25 + $0x19] sm:$0xf]  ;;  %v599_v45 = vadd.f32 %v1598_v14, %v591_v31  ;;  %v609_v49 = vld [vmem:[%s1949_s25 + $0x31] sm:$0xf] }
 0x22d   : >> { %v600_v46 = vadd.f32 %v1594_v13, %v592_v34  ;;  %v601_v47 = vadd.f32 %v1590_v12, %v593_v35  ;;  %v602_v48 = vadd.f32 %v1586_v11, %v594_v36  ;;  %v610_v50 = vld [vmem:[%s1949_s25 + $0x39] sm:$0xf]  ;;  %v611_v51 = vld [vmem:[%s1949_s25 + $0x41] sm:$0xf]  ;;  %v603_v52 = vadd.f32 %v1582_v10, %v595_v38  ;;  %v612_v54 = vld [vmem:[%s1949_s25 + $0x49] sm:$0xf] }
 0x22e   : >> { %v604_v53 = vadd.f32 %v1578_v9, %v596_v39  ;;  %v614_v55 = vmul.f32 %v613_v20, %v605_v37  ;;  %v615_v56 = vmul.f32 %v613_v20, %v606_v42  ;;  %v616_v57 = vmul.f32 %v613_v20, %v607_v43  ;;  %v630_v61 = vld [vmem:[%s1949_s25 + $0x2] sm:$0xf]  ;;  %v631_v62 = vld [vmem:[%s1949_s25 + $0xa] sm:$0xf]  ;;  %v632_v63 = vld [vmem:[%s1949_s25 + $0x12] sm:$0xf] }
 0x22f   : >> { %v617_v58 = vmul.f32 %v613_v20, %v608_v44  ;;  %v618_v59 = vmul.f32 %v613_v20, %v609_v49  ;;  %v619_v60 = vmul.f32 %v613_v20, %v610_v50  ;;  %v620_v0 = vmul.f32 %v613_v20, %v611_v51  ;;  %v633_v4 = vld [vmem:[%s1949_s25 + $0x1a] sm:$0xf]  ;;  %v634_v5 = vld [vmem:[%s1949_s25 + $0x32] sm:$0xf]  ;;  %v636_v11 = vld [vmem:[%s1949_s25 + $0x42] sm:$0xf] }
 0x230   : >> { %v621_v1 = vmul.f32 %v613_v20, %v612_v54  ;;  %v622_v2 = vadd.f32 %v614_v55, %v597_v40  ;;  %v623_v3 = vadd.f32 %v615_v56, %v598_v41  ;;  %v635_v6 = vld [vmem:[%s1949_s25 + $0x3a] sm:$0xf]  ;;  %v624_v7 = vadd.f32 %v616_v57, %v599_v45  ;;  %v637_v12 = vld [vmem:[%s1949_s25 + $0x4a] sm:$0xf]  ;;  %v1091_v25 = vld [vmem:[%s1949_s25 + $0x10] sm:$0xf] }
 0x231   : >> { %v625_v8 = vadd.f32 %v617_v58, %v600_v46  ;;  %v626_v9 = vadd.f32 %v618_v59, %v601_v47  ;;  %v627_v10 = vadd.f32 %v619_v60, %v602_v48  ;;  %v628_v13 = vadd.f32 %v620_v0, %v603_v52  ;;  %v1090_v24 = vld [vmem:[%s1949_s25 + $0x8] sm:$0xf]  ;;  %v1092_v26 = vld [vmem:[%s1949_s25 + $0x18] sm:$0xf]  ;;  %v1093_v31 = vld [vmem:[%s1949_s25 + $0x20] sm:$0xf] }
 0x232   : >> { %v629_v14 = vadd.f32 %v621_v1, %v604_v53  ;;  %v639_v15 = vmul.f32 %v1944_v21, %v630_v61  ;;  %v640_v16 = vmul.f32 %v1944_v21, %v631_v62  ;;  %v641_v17 = vmul.f32 %v1944_v21, %v632_v63  ;;  %v1094_v32 = vld [vmem:[%s1949_s25 + $0x38] sm:$0xf]  ;;  %v1095_v33 = vld [vmem:[%s1949_s25 + $0x40] sm:$0xf]  ;;  %v1096_v38 = vld [vmem:[%s1949_s25 + $0x48] sm:$0xf] }
 0x233   : >> { %v642_v19 = vmul.f32 %v1944_v21, %v633_v4  ;;  %v643_v20 = vmul.f32 %v1944_v21, %v634_v5  ;;  %v644_v23 = vmul.f32 %v1944_v21, %v635_v6  ;;  %v645_v27 = vmul.f32 %v1944_v21, %v636_v11  ;;  %v1097_v39 = vld [vmem:[%s1949_s25 + $0x50] sm:$0xf]  ;;  %v1098_v49 = vld [vmem:[%s1949_s25 + $0x9] sm:$0xf]  ;;  %v1100_v51 = vld [vmem:[%s1949_s25 + $0x19] sm:$0xf] }
 0x234   : >> { %v646_v28 = vmul.f32 %v1944_v21, %v637_v12  ;;  %v647_v29 = vadd.f32 %v639_v15, %v622_v2  ;;  %v648_v30 = vadd.f32 %v640_v16, %v623_v3  ;;  %v649_v34 = vadd.f32 %v641_v17, %v624_v7  ;;  %v1099_v50 = vld [vmem:[%s1949_s25 + $0x11] sm:$0xf]  ;;  %v1101_v54 = vld [vmem:[%s1949_s25 + $0x21] sm:$0xf]  ;;  %v1102_v55 = vld [vmem:[%s1949_s25 + $0x39] sm:$0xf] }
 0x235   : >> { %v650_v35 = vadd.f32 %v642_v19, %v625_v8  ;;  %v651_v36 = vadd.f32 %v643_v20, %v626_v9  ;;  %v652_v37 = vadd.f32 %v644_v23, %v627_v10  ;;  %v653_v40 = vadd.f32 %v645_v27, %v628_v13  ;;  %v1103_v56 = vld [vmem:[%s1949_s25 + $0x41] sm:$0xf]  ;;  %v1104_v60 = vld [vmem:[%s1949_s25 + $0x49] sm:$0xf]  ;;  %v1105_v61 = vld [vmem:[%s1949_s25 + $0x51] sm:$0xf] }
 0x236   : >> { %v654_v41 = vadd.f32 %v646_v28, %v629_v14  ;;  %v666_v21 = vmul.f32 %v1090_v24, %v1947_v22  ;;  %v667_v42 = vmul.f32 %v1091_v25, %v1947_v22  ;;  %v668_v43 = vmul.f32 %v1092_v26, %v1947_v22  ;;  %v1106_v6 = vld [vmem:[%s1949_s25 + $0xa] sm:$0xf]  ;;  %v1107_v7 = vld [vmem:[%s1949_s25 + $0x12] sm:$0xf]  ;;  %v1108_v12 = vld [vmem:[%s1949_s25 + $0x1a] sm:$0xf] }
 0x237   : >> { %v669_v44 = vmul.f32 %v1093_v31, %v1947_v22  ;;  %v670_v45 = vmul.f32 %v1094_v32, %v1947_v22  ;;  %v671_v46 = vmul.f32 %v1095_v33, %v1947_v22  ;;  %v672_v47 = vmul.f32 %v1096_v38, %v1947_v22  ;;  %v1109_v13 = vld [vmem:[%s1949_s25 + $0x22] sm:$0xf]  ;;  %v1110_v14 = vld [vmem:[%s1949_s25 + $0x3a] sm:$0xf]  ;;  %v1112_v20 = vld [vmem:[%s1949_s25 + $0x4a] sm:$0xf] }
 0x238   : >> { %v673_v48 = vmul.f32 %v1097_v39, %v1947_v22  ;;  %v674_v52 = vadd.f32 %v666_v21, %v647_v29  ;;  %v675_v53 = vadd.f32 %v667_v42, %v648_v30  ;;  %v676_v57 = vadd.f32 %v668_v43, %v649_v34  ;;  %v1111_v19 = vld [vmem:[%s1949_s25 + $0x42] sm:$0xf]  ;;  %v1113_v23 = vld [vmem:[%s1949_s25 + $0x52] sm:$0xf]  ;;  %v577_v32 = vld [vmem:[%s1938_s14 + $0x8] sm:$0x7] }
 0x239   : >> { %v677_v58 = vadd.f32 %v669_v44, %v650_v35  ;;  %v678_v59 = vadd.f32 %v670_v45, %v651_v36  ;;  %v690_v62 = vperm.slane %v1942_v18, 1  ;;  %v679_v22 = vadd.f32 %v671_v46, %v652_v37  ;;  %v1114_v37 = vld [vmem:[%s1949_s25 + $0x10] sm:$0xf]  ;;  %v1115_v38 = vld [vmem:[%s1949_s25 + $0x18] sm:$0xf]  ;;  %s1157_s12 = sshll.u32 (%p561_p11), %s1558_s30, 3 }
 0x23a   : >> { %v680_v63 = vadd.f32 %v672_v47, %v653_v40  ;;  %v681_v0 = vadd.f32 %v673_v48, %v654_v41  ;;  %v715_v1 = vperm.slane %v1942_v18, 2  ;;  %v1116_v39 = vld [vmem:[%s1949_s25 + $0x20] sm:$0xf]  ;;  %v1117_v42 = vld [vmem:[%s1949_s25 + $0x28] sm:$0xf]  ;;  %vm850_vm4 = vcmask (%p561_p11), 130048  }
 0x23b   : >> { %v691_v2 = vmul.f32 %v1098_v49, %v690_v62  ;;  %v692_v3 = vmul.f32 %v1099_v50, %v690_v62  ;;  %v693_v4 = vmul.f32 %v1100_v51, %v690_v62  ;;  %v694_v5 = vmul.f32 %v1101_v54, %v690_v62  ;;  %v1118_v43 = vld [vmem:[%s1949_s25 + $0x40] sm:$0xf]  ;;  %v1119_v44 = vld [vmem:[%s1949_s25 + $0x48] sm:$0xf]  ;;  %v1120_v48 = vld [vmem:[%s1949_s25 + $0x50] sm:$0xf] }
 0x23c   : >> { %v695_v8 = vmul.f32 %v1102_v55, %v690_v62  ;;  %v696_v9 = vmul.f32 %v1103_v56, %v690_v62  ;;  %v697_v10 = vmul.f32 %v1104_v60, %v690_v62  ;;  %v698_v11 = vmul.f32 %v1105_v61, %v690_v62  ;;  %v1121_v49 = vld [vmem:[%s1949_s25 + $0x58] sm:$0xf]  ;;  %s1147_s13 = sshll.u32 (%p561_p11), %s2174_s24, 4  ;;  %s2175_s20 = sld [smem:[#allocation22_spill]] (%p561_p11) }
 0x23d   : >> { %v699_v15 = vadd.f32 %v691_v2, %v674_v52  ;;  %v700_v16 = vadd.f32 %v692_v3, %v675_v53  ;;  %v701_v18 = vadd.f32 %v693_v4, %v676_v57  ;;  %v702_v17 = vadd.f32 %v694_v5, %v677_v58  ;;  %v1123_v60 = vld [vmem:[%s1949_s25 + $0x19] sm:$0xf]  ;;  %v1126_v2 = vld [vmem:[%s1949_s25 + $0x41] sm:$0xf]  ;;  %s910_s28 = sadd.s32 (%p561_p11), %s1157_s12, %s1147_s13  ;;  %s913_s17 = sshll.u32 (%p561_p11), %s1875_s19, 4  ;;  %s914_s17 = int_to_ptr.vmem [resolvable:$true] %s913_s17 }
 0x23e   : >> { %v703_v24 = vadd.f32 %v695_v8, %v678_v59  ;;  %v704_v25 = vadd.f32 %v696_v9, %v679_v22  ;;  %v705_v26 = vadd.f32 %v697_v10, %v680_v63  ;;  %v706_v27 = vadd.f32 %v698_v11, %v681_v0  ;;  %v1122_v59 = vld [vmem:[%s1949_s25 + $0x11] sm:$0xf]  ;;  %v1124_v0 = vld [vmem:[%s1949_s25 + $0x21] sm:$0xf]  ;;  %v1129_v9 = vld [vmem:[%s1949_s25 + $0x59] sm:$0xf] }
 0x23f   : >> { %v716_v28 = vmul.f32 %v1106_v6, %v715_v1  ;;  %v717_v29 = vmul.f32 %v1107_v7, %v715_v1  ;;  %v718_v30 = vmul.f32 %v1108_v12, %v715_v1  ;;  %v719_v31 = vmul.f32 %v1109_v13, %v715_v1  ;;  %v1127_v7 = vld [vmem:[%s1949_s25 + $0x49] sm:$0xf]  ;;  %v1128_v8 = vld [vmem:[%s1949_s25 + $0x51] sm:$0xf]  ;;  %s1148_s11 = sshll.u32 (%p561_p11), %s910_s28, 2  ;;  %s898_s10 = scalar_lea.sflag (%p561_p11), [#allocation7], %s302_s6 }
 0x240   : >> { %v720_v33 = vmul.f32 %v1110_v14, %v715_v1  ;;  %v721_v34 = vmul.f32 %v1111_v19, %v715_v1  ;;  %v722_v35 = vmul.f32 %v1112_v20, %v715_v1  ;;  %v723_v36 = vmul.f32 %v1113_v23, %v715_v1  ;;  %v1125_v1 = vld [vmem:[%s1949_s25 + $0x29] sm:$0xf]  ;;  %v1131_v19 = vld [vmem:[%s1949_s25 + $0x1a] sm:$0xf] }
 0x241   : >> { %v724_v40 = vadd.f32 %v716_v28, %v699_v15  ;;  %v725_v41 = vadd.f32 %v717_v29, %v700_v16  ;;  %v726_v21 = vadd.f32 %v718_v30, %v701_v18  ;;  %v727_v45 = vadd.f32 %v719_v31, %v702_v17  ;;  %v1130_v17 = vld [vmem:[%s1949_s25 + $0x12] sm:$0xf]  ;;  %v1134_v28 = vld [vmem:[%s1949_s25 + $0x42] sm:$0xf] }
 0x242   : >> { %v728_v46 = vadd.f32 %v720_v33, %v703_v24  ;;  %v729_v47 = vadd.f32 %v721_v34, %v704_v25  ;;  %v742_v50 = vperm.slane %v577_v32, 0  ;;  %v730_v51 = vadd.f32 %v722_v35, %v705_v26  ;;  %v1132_v26 = vld [vmem:[%s1949_s25 + $0x22] sm:$0xf]  ;;  %v1135_v33 = vld [vmem:[%s1949_s25 + $0x4a] sm:$0xf]  ;;  %s912_s22 = scalar_lea.hbm (%p561_p11), %s2175_s20, %s1148_s11  ;;  %s1432_s16 = scalar_lea.hbm (%p561_p11), %s2175_s20, 128 }
 0x243   : >> { %v731_v52 = vadd.f32 %v723_v36, %v706_v27  ;;  %v767_v53 = vperm.slane %v577_v32, 1  ;;  %v792_v54 = vperm.slane %v577_v32, 2  ;;  %v1133_v27 = vld [vmem:[%s1949_s25 + $0x2a] sm:$0xf]  ;;  %v1136_v34 = vld [vmem:[%s1949_s25 + $0x52] sm:$0xf] }
 0x244   : >> { %v743_v55 = vmul.f32 %v1114_v37, %v742_v50  ;;  %v744_v56 = vmul.f32 %v1115_v38, %v742_v50  ;;  %v745_v57 = vmul.f32 %v1116_v39, %v742_v50  ;;  %v746_v58 = vmul.f32 %v1117_v42, %v742_v50  ;;  %v1137_v35 = vld [vmem:[%s1949_s25 + $0x5a] sm:$0xf]  ;;  %s915_s21 = sshll.u32 (%p561_p11), %s912_s22, 4  ;;  %s916_s21 = int_to_ptr.hbm [resolvable:$true] %s915_s21 }
 0x245   : >> { %v747_v61 = vmul.f32 %v1118_v43, %v742_v50  ;;  %v748_v62 = vmul.f32 %v1119_v44, %v742_v50  ;;  %v749_v22 = vmul.f32 %v1120_v48, %v742_v50  ;;  %v750_v63 = vmul.f32 %v1121_v49, %v742_v50  ;;  %s1426_s7 = sshra.s32 (%p561_p11), %s916_s21, 4  ;;  %s1427_s7 = int_to_ptr.hbm [resolvable:$true] %s1426_s7 }
 0x246   : >> { %v751_v3 = vadd.f32 %v743_v55, %v724_v40  ;;  %v752_v4 = vadd.f32 %v744_v56, %v725_v41  ;;  %v753_v5 = vadd.f32 %v745_v57, %v726_v21  ;;  %v754_v6 = vadd.f32 %v746_v58, %v727_v45  ;;  %s1428_s14 = scalar_lea.hbm (%p561_p11), %s1427_s7, 32  ;;  %p1433_p5 = scmp.lt.s32.totalorder (%p561_p11), %s1427_s7, %s2175_s20 }
 0x247   : >> { %v755_v10 = vadd.f32 %v747_v61, %v728_v46  ;;  %v756_v11 = vadd.f32 %v748_v62, %v729_v47  ;;  %v757_v12 = vadd.f32 %v749_v22, %v730_v51  ;;  %v758_v13 = vadd.f32 %v750_v63, %v731_v52  ;;  %p1429_p0 = scmp.ne.s32.totalorder (%p561_p11), %s1427_s7, %s1428_s14  ;;  %p1434_p7 = scmp.lt.s32.totalorder (%p561_p11), %s1432_s16, %s1428_s14 }
 0x248   : >> { %v768_v14 = vmul.f32 %v1122_v59, %v767_v53  ;;  %v769_v15 = vmul.f32 %v1123_v60, %v767_v53  ;;  %v770_v16 = vmul.f32 %v1124_v0, %v767_v53  ;;  %v771_v18 = vmul.f32 %v1125_v1, %v767_v53 }
 0x249   : >> { %v772_v20 = vmul.f32 %v1126_v2, %v767_v53  ;;  %v773_v23 = vmul.f32 %v1127_v7, %v767_v53  ;;  %v774_v24 = vmul.f32 %v1128_v8, %v767_v53  ;;  %v775_v25 = vmul.f32 %v1129_v9, %v767_v53  ;;  %p1430_p2 = pnand (%p561_p11), %p1429_p0, %p1731_p6  ;;  %p1435_p8 = por (%p561_p11), %p1434_p7, %p1433_p5 }
 0x24a   : >> { %v776_v29 = vadd.f32 %v768_v14, %v751_v3  ;;  %v777_v30 = vadd.f32 %v769_v15, %v752_v4  ;;  %v778_v31 = vadd.f32 %v770_v16, %v753_v5  ;;  %v779_v32 = vadd.f32 %v771_v18, %v754_v6 }
 0x24b   : >> { %v780_v36 = vadd.f32 %v772_v20, %v755_v10  ;;  %v781_v37 = vadd.f32 %v773_v23, %v756_v11  ;;  %v782_v38 = vadd.f32 %v774_v24, %v757_v12  ;;  %v783_v39 = vadd.f32 %v775_v25, %v758_v13  ;;  %p1431_p3 = pneg (%p561_p11), %p1430_p2 }
 0x24c   : >> { %v793_v40 = vmul.f32 %v1130_v17, %v792_v54  ;;  %v794_v41 = vmul.f32 %v1131_v19, %v792_v54  ;;  %v795_v21 = vmul.f32 %v1132_v26, %v792_v54  ;;  %v796_v42 = vmul.f32 %v1133_v27, %v792_v54 }
 0x24d   : >> { %v797_v43 = vmul.f32 %v1134_v28, %v792_v54  ;;  %v798_v44 = vmul.f32 %v1135_v33, %v792_v54  ;;  %v799_v45 = vmul.f32 %v1136_v34, %v792_v54  ;;  %v800_v46 = vmul.f32 %v1137_v35, %v792_v54  ;;  %563 = sbr.rel (!%p561_p11) target bundleno = 548 (0x224), region = 138  ;;  %v1156_v54 = vld [vmem:[%s2140_s5] sm:$0xff] (%p561_p11)  ;;  %p1436_p9 = pnand (%p561_p11), %p1435_p8, %p1431_p3 }
 0x24e   : >> { %v801_v47 = vadd.f32 %v793_v40, %v776_v29   ;;  %v802_v48 = vadd.f32 %v794_v41, %v777_v30   ;;  %v803_v49 = vadd.f32 %v795_v21, %v778_v31   ;;  %v804_v50 = vadd.f32 %v796_v42, %v779_v32   ;;  %864 = vmatpush.bf16.msra.mxu0 (%p561_p11), %v1156_v54 }
 0x24f   : >> { %v805_v51 = vadd.f32 %v797_v43, %v780_v36   ;;  %v806_v52 = vadd.f32 %v798_v44, %v781_v37   ;;  %v807_v53 = vadd.f32 %v799_v45, %v782_v38   ;;  %v808_v55 = vadd.f32 %v800_v46, %v783_v39   ;;  %1159 = vmatpush.bf16.msra.mxu1 (%p561_p11), %v1156_v54 }
 0x250   : >> { %v2170_v13 = vmov %v804_v50  ;;  %v2171_v14 = vmov %v803_v49  ;;  %v2172_v15 = vmov %v802_v48  ;;  %v2173_v16 = vmov %v801_v47  ;;  %817 = vst [vmem:[#allocation1] ss:$2 sm:$0xff] (%p561_p11), %v801_v47 }
 0x251   : >> { %v2166_v9 = vmov %v808_v55  ;;  %v2167_v10 = vmov %v807_v53  ;;  %v2168_v11 = vmov %v806_v52  ;;  %v2169_v12 = vmov %v805_v51  ;;  %819 = vst [vmem:[#allocation1 + $0x1] ss:$2 sm:$0xff] (%p561_p11), %v802_v48 }
 0x252   : > { %821 = vst [vmem:[#allocation1 + $0x10] ss:$2 sm:$0xff] %v803_v49  ;;  %vm888_vm5 = vcmask 60416  }
 0x253   : > { %823 = vst [vmem:[#allocation1 + $0x11] ss:$2 sm:$0xff] %v804_v50 }
 0x254   : > { %825 = vst [vmem:[#allocation1 + $0x20] ss:$2 sm:$0xff] %v805_v51 }
 0x255   : > { %827 = vst [vmem:[#allocation1 + $0x21] ss:$2 sm:$0xff] %v806_v52 }
 0x256   : > { %829 = vst [vmem:[#allocation1 + $0x30] ss:$2 sm:$0xff] %v807_v53 }
 0x257   : > { %831 = vst [vmem:[#allocation1 + $0x31] ss:$2 sm:$0xff] %v808_v55 }
 0x258   : > { %v832_v56 = vld.sshfl [vmem:[#allocation1] sm:$0xff pattern:$0x75316420] }
 0x25a   : > { %v833_v57 = vld.sshfl [vmem:[#allocation1 + $0x10] sm:$0xff pattern:$0x75316420] }
 0x25b   : > { %v840_v58 = vpack.c.bf16 %v833_v57, %v832_v56 }
 0x25c   : > { %v834_v59 = vld.sshfl [vmem:[#allocation1 + $0x20] sm:$0xff pattern:$0x75316420] }
 0x25d   : > { %1142 = vmatmul.msk.bf16.vlgmr.msra.gmra.mxu0 %vm850_vm4, %v840_v58 }
 0x25e   : > { %v835_v60 = vld.sshfl [vmem:[#allocation1 + $0x30] sm:$0xff pattern:$0x75316420] }
 0x25f   : > { %v841_v61 = vpack.c.bf16 %v835_v60, %v834_v59 }
 0x261   : > { %1143 = vmatmul.msk.bf16.vlgmr.msra.gmra.mxu1 %vm850_vm4, %v841_v61 }
 0x2da   : > { %v866_v62 = vpop.f32.mrf.mxu0 }
 0x2db   : > { %v880_v22 = vrot.slane %v866_v62, 4  ;;  %889 = vst.msk [vmem:[%s1875_s19] sm:$0xf] %vm888_vm5, %v866_v62 }
 0x2dd   : > { %890 = vst.msk [vmem:[%s1875_s19 + $0x4] sm:$0xf] %vm888_vm5, %v880_v22 }
 0x2de   : > { %v871_v63 = vpop.f32.mrf.mxu1 }
 0x2df   : > { %v882_v0 = vrot.slane %v871_v63, 4  ;;  %893 = vst.msk [vmem:[%s1875_s19 + $0x10] sm:$0xf] %vm888_vm5, %v871_v63 }
 0x2e1   : > { %894 = vst.msk [vmem:[%s1875_s19 + $0x14] sm:$0xf] %vm888_vm5, %v882_v0 }
 0x2e2   : > { %v868_v1 = vpop.f32.mrf.mxu0 }
 0x2e3   : > { %v881_v2 = vrot.slane %v868_v1, 4  ;;  %891 = vst.msk [vmem:[%s1875_s19 + $0x8] sm:$0xf] %vm888_vm5, %v868_v1 }
 0x2e5   : > { %892 = vst.msk [vmem:[%s1875_s19 + $0xc] sm:$0xf] %vm888_vm5, %v881_v2 }
 0x2e6   : > { %v873_v3 = vpop.f32.mrf.mxu1 }
 0x2e7   : > { %v883_v4 = vrot.slane %v873_v3, 4  ;;  %895 = vst.msk [vmem:[%s1875_s19 + $0x18] sm:$0xf] %vm888_vm5, %v873_v3 }
 0x2e9   : > { %896 = vst.msk [vmem:[%s1875_s19 + $0x1c] sm:$0xf] %vm888_vm5, %v883_v4 }
 0x2ea   : > { %1439 = shalt.err (!%p1436_p9)
}
 0x2eb   : > { %s1618_s6 = smov 64   ;;  %s1619_s19 = smov 4  }
 0x2ec   : > { %1166 = dma.vmem_to_hbm [thread:$0]  (%p1731_p6), %s914_s17, 512, %s916_s21, %s898_s10, %s1618_s6, %s1618_s6, %s1619_s19  }
 0x2ed PF: > { %s2177_s13 = sld [smem:[#allocation14_spill]]  ;;  %p1183_p12 = scmp.ge.s32.totalorder %s1574_s9, 2 }
 0x2ef   : > { %p1177_p13 = pnand %p1183_p12, %p1737_p10 }
 0x2f1   : > { %p1178_p1 = pneg %p1177_p13 }
 0x2f3   : > { %s930_s11 = sand.u32 1, %s2177_s13  }
 0x2f4   : > { %s931_s30 = scalar_lea.sflag [#allocation7], %s930_s11 }
 0x2f5   : > { %1529 = dma.done.wait (%p1178_p1), %s931_s30, 512  }
 0x2f6   : > { %1531 = vsyncadd (%p1178_p1), %s931_s30, 4294966784  ;;  %s25_s9 = sadd.s32 1, %s1574_s9   ;;  %s2179_s30 = sld [smem:[#allocation16_spill]] }
 0x2f7   : > { %p22_p4 = scmp.ge.s32.totalorder %s25_s9, 6   ;;  %s2180_s7 = sld [smem:[#allocation19_spill]] }
 0x2f8   : > { %s2181_s18 = sld [smem:[#allocation20_spill]]  ;;  %s2182_s25 = smov %s1538_s26 }
 0x2f9   : > { %s2183_s26 = smov %s1542_s27  ;;  %s2184_s27 = smov %s1779_s15 }
 0x2fa   : > { %s2185_s28 = smov %s1550_s29  ;;  %s2186_s29 = smov %s1554_s0 }
 0x2fb   : > { %s2187_s0 = smov %s1776_s4  ;;  %s2188_s1 = smov %s1570_s8 }
 0x2fc   :  { %24 = sbr.rel (!%p22_p4) target bundleno = 15 (0xf), region = 149 }
 0x2fe   : > { %s2189_s8 = smov %s2181_s18 }
 0x301   :  { %937 = vsyncpa [#allocation6], 1 }
 0x302   :  { %939 = vsyncpa [#allocation6 + $0x1], 1 }
 0x303   :  { %940 = vsyncpa [#allocation9], 1 }
 0x304   :  { %941 = vsyncpa [#allocation7], 1 }
 0x305   :  { %943 = vsyncpa [#allocation7 + $0x1], 1 }

</bundles_post_ra>
